<compile_context>
chip_gen: v7x
topology: tpu7x:2x2x1
jax: 0.10.0
libtpu: 0.0.40
codegen_flags: <defaults>
</compile_context>

<pallas_src>
import numpy as np

import jax
import jax.numpy as jnp
from jax.experimental import pallas as pl
from jax.experimental.pallas import tpu as pltpu


def _build_halo_masks(H, W, K, pad):
    """(K*K, H*W) f32 0/1 masks reproducing the zero-pad halo for each tap."""
    HW = H * W
    lin = np.arange(HW)
    h = lin // W
    w = lin - h * W
    m = np.empty((K * K, HW), np.float32)
    for kh in range(K):
        dh = kh - pad
        for kw in range(K):
            dc = kw - pad
            valid = ((h + dh >= 0) & (h + dh <= H - 1)
                     & (w + dc >= 0) & (w + dc <= W - 1))
            m[kh * K + kw] = valid.astype(np.float32)
    return m


def _make_kernel(W, C_in, C_out, K, pad, Nb, HW, use_mxu):
    rows_in = Nb * C_in

    def kernel(x_ref, wdw_ref, wpw_ref, bias_ref, mask_ref, o_ref):
        # x_ref   : (1, Nb*C_in, H*W)   Nb packed images, spatial on lanes
        # wdw_ref : (Nb*C_in, K*K)      depthwise weights, tiled across Nb
        # wpw_ref : (C_out, C_in)       pointwise 1x1 weights
        # bias_ref: (C_out, 1)          fused bias (= Wpw @ b_dw + b_pw)
        # mask_ref: (K*K, H*W)          precomputed 0/1 halo masks
        # o_ref   : (1, Nb*C_out, H*W)
        x = x_ref[0].astype(jnp.float32)                    # exact f32 tap math

        # hoisted out of the tap loop: weights + masks loaded / sliced once
        wdw = wdw_ref[...].astype(jnp.float32)              # (rows_in, K*K)
        wcols = [wdw[:, t:t + 1] for t in range(K * K)]     # (rows_in, 1) each
        masks = mask_ref[...]                               # (K*K, HW) f32
        mrows = [masks[t:t + 1, :] for t in range(K * K)]   # (1, HW) each

        # ---- depthwise KxK: lane roll (XLU) + mask mul + per-channel FMA ----
        acc = jnp.zeros((rows_in, HW), jnp.float32)
        for kh in range(K):
            dh = kh - pad
            for kw in range(K):
                dc = kw - pad
                s = dh * W + dc                             # flattened src offset
                t = kh * K + kw
                if s == 0:
                    acc = acc + x * wcols[t]                # center tap: no halo
                else:
                    tap = pltpu.roll(x, shift=(-s) % HW, axis=1)
                    acc = acc + (tap * mrows[t]) * wcols[t]

        # ---- pointwise 1x1 (exact f32 on both branches) ----
        wpw = wpw_ref[...].astype(jnp.float32)              # (C_out, C_in)
        bias = bias_ref[...].astype(jnp.float32)            # (C_out, 1)
        ys = []
        for n in range(Nb):
            a = acc[n * C_in:(n + 1) * C_in, :]             # (C_in, HW)
            if use_mxu:
                y = jnp.dot(wpw, a, preferred_element_type=jnp.float32)
            else:
                # tiny channels: MXU nearly empty -> VPU broadcast-FMAs
                y = jnp.zeros((C_out, HW), jnp.float32)
                for ci in range(C_in):
                    y = y + a[ci:ci + 1, :] * wpw[:, ci:ci + 1]
            ys.append(y + bias)

        out = ys[0] if Nb == 1 else jnp.concatenate(ys, axis=0)
        o_ref[0] = out.astype(o_ref.dtype)                  # one lane-dense store

    return kernel


def _choose_batch_pack(N, C_in, C_out, HW, itemsize):
    """Pick Nb (images per grid step) and return (Nb, per-step VMEM estimate)."""
    def vmem_est(nb):
        blk_in = 2 * nb * C_in * HW * itemsize              # double-buffered in
        blk_out = 2 * nb * C_out * HW * itemsize            # double-buffered out
        interm = (4 * nb * C_in + nb * C_out) * HW * 4      # f32 acc/tap/out temps
        return blk_in + blk_out + interm

    budget = 12 << 20       # headroom vs v7x's 64 MiB VMEM / v5e scoped default
    target = 2 << 20        # ~2 MiB input blocks -> near HBM roofline
    divisors = [d for d in range(1, N + 1)
                if N % d == 0 and d <= 16 and vmem_est(d) <= budget]
    if not divisors:
        divisors = [1]

    def score(nb):
        rows = nb * C_in
        blk = rows * HW * itemsize
        return (min(rows, 8),                   # 1) fill the 8 sublanes
                1 if (N // nb) >= 2 else 0,     # 2) keep >=2 grid steps (v7x 2 TCs)
                min(blk, target),               # 3) grow toward DMA sweet spot
                -blk)                           # 4) ... but no bigger than needed

    nb = max(divisors, key=score)
    return nb, vmem_est(nb)


def depthwise_separable_conv(x_nchw, w_dw, b_dw, w_pw, b_pw,
                             kernel_size=3, padding=1):
    """
    x_nchw : (N, C_in, H, W)      PyTorch layout
    w_dw   : (C_in, 1, K, K)      depthwise conv weight (groups = C_in)
    b_dw   : (C_in,)
    w_pw   : (C_out, C_in, 1, 1)  pointwise conv weight
    b_pw   : (C_out,)
    returns (N, C_out, H, W)  ==  pointwise(depthwise(x))   (stride=1, "same")
    """
    N, C_in, H, W = x_nchw.shape
    C_out = w_pw.shape[0]
    K = kernel_size
    assert K % 2 == 1 and padding == (K - 1) // 2, \
        "kernel implements the module defaults: stride=1, 'same' padding"
    HW = H * W
    itemsize = jnp.dtype(x_nchw.dtype).itemsize

    Nb, vmem_est = _choose_batch_pack(N, C_in, C_out, HW, itemsize)
    G = N // Nb

    # copy-free HBM re-views: batch x channel packed on sublanes, spatial on lanes
    x_view = x_nchw.reshape(G, Nb * C_in, HW)
    wdw = jnp.tile(w_dw[:, 0].reshape(C_in, K * K), (Nb, 1))       # (Nb*C_in, K*K)
    wpwT = w_pw[:, :, 0, 0]                                         # (C_out, C_in)
    fused_bias = (wpwT.astype(jnp.float32) @ b_dw.astype(jnp.float32)
                  + b_pw.astype(jnp.float32)).reshape(C_out, 1)
    masks = jnp.asarray(_build_halo_masks(H, W, K, padding))        # (K*K, HW)

    use_mxu = C_in > 32 or C_out > 32          # exact f32 dot for larger channels
    kern = _make_kernel(W, C_in, C_out, K, padding, Nb, HW, use_mxu)

    # explicit scoped-VMEM limit with headroom (re-derived for v7x's 64 MiB)
    vmem_limit = int(min(max(2 * vmem_est, 32 << 20), 48 << 20))

    out_view = pl.pallas_call(
        kern,
        out_shape=jax.ShapeDtypeStruct((G, Nb * C_out, HW), x_nchw.dtype),
        grid_spec=pltpu.PrefetchScalarGridSpec(
            num_scalar_prefetch=0,
            grid=(G,),
            in_specs=[
                pl.BlockSpec((1, Nb * C_in, HW), lambda g: (g, 0, 0)),
                pl.BlockSpec((Nb * C_in, K * K), lambda g: (0, 0)),
                pl.BlockSpec((C_out, C_in), lambda g: (0, 0)),
                pl.BlockSpec((C_out, 1), lambda g: (0, 0)),
                pl.BlockSpec((K * K, HW), lambda g: (0, 0)),
            ],
            out_specs=pl.BlockSpec((1, Nb * C_out, HW), lambda g: (g, 0, 0)),
        ),
        compiler_params=pltpu.CompilerParams(
            dimension_semantics=("parallel",),
            vmem_limit_bytes=vmem_limit),
    )(x_view, wdw, wpwT, fused_bias, masks)

    return out_view.reshape(N, C_out, H, W)


def _reference(x_nchw, w_dw, b_dw, w_pw, b_pw, padding=1):
    """Pure-JAX reference (lax conv) with PyTorch semantics for validation."""
    C_in = x_nchw.shape[1]
    dw = jax.lax.conv_general_dilated(
        x_nchw, w_dw,
        window_strides=(1, 1),
        padding=[(padding, padding), (padding, padding)],
        dimension_numbers=("NCHW", "OIHW", "NCHW"),
        feature_group_count=C_in,
    ) + b_dw.reshape(1, -1, 1, 1)
    pw = jax.lax.conv_general_dilated(
        dw, w_pw,
        window_strides=(1, 1), padding=[(0, 0), (0, 0)],
        dimension_numbers=("NCHW", "OIHW", "NCHW"),
    ) + b_pw.reshape(1, -1, 1, 1)
    return pw


if __name__ == "__main__":
    key = jax.random.PRNGKey(0)
    k1, k2, k3, k4, k5 = jax.random.split(key, 5)

    N, C_in, H, W = 2, 4, 16, 16
    C_out, K = 8, 3

    x = jax.random.normal(k1, (N, C_in, H, W), dtype=jnp.float32)
    # deterministic parameter init (synthetic; shapes match nn.Conv2d in __init__)
    w_dw = jax.random.normal(k2, (C_in, 1, K, K), dtype=jnp.float32) * 0.1
    b_dw = jax.random.normal(k3, (C_in,), dtype=jnp.float32) * 0.1
    w_pw = jax.random.normal(k4, (C_out, C_in, 1, 1), dtype=jnp.float32) * 0.1
    b_pw = jax.random.normal(k5, (C_out,), dtype=jnp.float32) * 0.1

    out = depthwise_separable_conv(x, w_dw, b_dw, w_pw, b_pw)
    out = jax.block_until_ready(out)

    ref = jax.block_until_ready(_reference(x, w_dw, b_dw, w_pw, b_pw))
    assert out.shape == (N, C_out, H, W)
    assert jnp.allclose(out, ref, atol=1e-4, rtol=1e-4), "mismatch vs reference"

    print("KERNEL_OK")
</pallas_src>

<mosaic_0001>
module attributes {stable_mosaic.version = 11 : i64} {
  func.func @kernel(%arg0: i32, %arg1: memref<1x8x256xf32, #tpu.memory_space<vmem>>, %arg2: memref<8x9xf32, #tpu.memory_space<vmem>>, %arg3: memref<8x4xf32, #tpu.memory_space<vmem>>, %arg4: memref<8x1xf32, #tpu.memory_space<vmem>>, %arg5: memref<9x256xf32, #tpu.memory_space<vmem>>, %arg6: memref<1x16x256xf32, #tpu.memory_space<vmem>>) attributes {dimension_semantics = [#tpu.dimension_semantics<parallel>], iteration_bounds = array<i64: 1>, scalar_prefetch = 0 : i64, scratch_operands = 0 : i64, tpu.core_type = #tpu.core_type<tc>, window_params = [{transform_indices = @transform_0, window_bounds = array<i64: 1, 8, 256>}, {pipeline_mode = #tpu.pipeline_mode<synchronous>, transform_indices = @transform_1, window_bounds = array<i64: 8, 9>}, {pipeline_mode = #tpu.pipeline_mode<synchronous>, transform_indices = @transform_2, window_bounds = array<i64: 8, 4>}, {pipeline_mode = #tpu.pipeline_mode<synchronous>, transform_indices = @transform_3, window_bounds = array<i64: 8, 1>}, {pipeline_mode = #tpu.pipeline_mode<synchronous>, transform_indices = @transform_4, window_bounds = array<i64: 9, 256>}, {transform_indices = @transform_5, window_bounds = array<i64: 1, 16, 256>}]} {
    %c0 = arith.constant 0 : index
    %c0_0 = arith.constant 0 : index
    %c0_1 = arith.constant 0 : index
    %0 = vector.load %arg1[%c0, %c0_0, %c0_1] : memref<1x8x256xf32, #tpu.memory_space<vmem>>, vector<1x8x256xf32>
    %1 = vector.shape_cast %0 : vector<1x8x256xf32> to vector<8x256xf32>
    %c0_2 = arith.constant 0 : index
    %c0_3 = arith.constant 0 : index
    %2 = vector.load %arg2[%c0_2, %c0_3] : memref<8x9xf32, #tpu.memory_space<vmem>>, vector<8x9xf32>
    %3 = vector.extract_strided_slice %2 {offsets = [0, 0], sizes = [8, 1], strides = [1, 1]} : vector<8x9xf32> to vector<8x1xf32>
    %4 = vector.extract_strided_slice %2 {offsets = [0, 1], sizes = [8, 1], strides = [1, 1]} : vector<8x9xf32> to vector<8x1xf32>
    %5 = vector.extract_strided_slice %2 {offsets = [0, 2], sizes = [8, 1], strides = [1, 1]} : vector<8x9xf32> to vector<8x1xf32>
    %6 = vector.extract_strided_slice %2 {offsets = [0, 3], sizes = [8, 1], strides = [1, 1]} : vector<8x9xf32> to vector<8x1xf32>
    %7 = vector.extract_strided_slice %2 {offsets = [0, 4], sizes = [8, 1], strides = [1, 1]} : vector<8x9xf32> to vector<8x1xf32>
    %8 = vector.extract_strided_slice %2 {offsets = [0, 5], sizes = [8, 1], strides = [1, 1]} : vector<8x9xf32> to vector<8x1xf32>
    %9 = vector.extract_strided_slice %2 {offsets = [0, 6], sizes = [8, 1], strides = [1, 1]} : vector<8x9xf32> to vector<8x1xf32>
    %10 = vector.extract_strided_slice %2 {offsets = [0, 7], sizes = [8, 1], strides = [1, 1]} : vector<8x9xf32> to vector<8x1xf32>
    %11 = vector.extract_strided_slice %2 {offsets = [0, 8], sizes = [8, 1], strides = [1, 1]} : vector<8x9xf32> to vector<8x1xf32>
    %c0_4 = arith.constant 0 : index
    %c0_5 = arith.constant 0 : index
    %12 = vector.load %arg5[%c0_4, %c0_5] : memref<9x256xf32, #tpu.memory_space<vmem>>, vector<9x256xf32>
    %13 = vector.extract_strided_slice %12 {offsets = [0, 0], sizes = [1, 256], strides = [1, 1]} : vector<9x256xf32> to vector<1x256xf32>
    %14 = vector.extract_strided_slice %12 {offsets = [1, 0], sizes = [1, 256], strides = [1, 1]} : vector<9x256xf32> to vector<1x256xf32>
    %15 = vector.extract_strided_slice %12 {offsets = [2, 0], sizes = [1, 256], strides = [1, 1]} : vector<9x256xf32> to vector<1x256xf32>
    %16 = vector.extract_strided_slice %12 {offsets = [3, 0], sizes = [1, 256], strides = [1, 1]} : vector<9x256xf32> to vector<1x256xf32>
    %17 = vector.extract_strided_slice %12 {offsets = [5, 0], sizes = [1, 256], strides = [1, 1]} : vector<9x256xf32> to vector<1x256xf32>
    %18 = vector.extract_strided_slice %12 {offsets = [6, 0], sizes = [1, 256], strides = [1, 1]} : vector<9x256xf32> to vector<1x256xf32>
    %19 = vector.extract_strided_slice %12 {offsets = [7, 0], sizes = [1, 256], strides = [1, 1]} : vector<9x256xf32> to vector<1x256xf32>
    %20 = vector.extract_strided_slice %12 {offsets = [8, 0], sizes = [1, 256], strides = [1, 1]} : vector<9x256xf32> to vector<1x256xf32>
    %cst = arith.constant 0.000000e+00 : f32
    %21 = vector.broadcast %cst : f32 to vector<8x256xf32>
    %c17_i32 = arith.constant 17 : i32
    %22 = tpu.dynamic_rotate %1 by %c17_i32 dim 1 : vector<8x256xf32>, i32 -> vector<8x256xf32>
    %23 = vector.broadcast %13 : vector<1x256xf32> to vector<8x256xf32>
    %24 = arith.mulf %22, %23 : vector<8x256xf32>
    %25 = vector.broadcast %3 : vector<8x1xf32> to vector<8x256xf32>
    %26 = arith.mulf %24, %25 : vector<8x256xf32>
    %27 = arith.addf %21, %26 : vector<8x256xf32>
    %c16_i32 = arith.constant 16 : i32
    %28 = tpu.dynamic_rotate %1 by %c16_i32 dim 1 : vector<8x256xf32>, i32 -> vector<8x256xf32>
    %29 = vector.broadcast %14 : vector<1x256xf32> to vector<8x256xf32>
    %30 = arith.mulf %28, %29 : vector<8x256xf32>
    %31 = vector.broadcast %4 : vector<8x1xf32> to vector<8x256xf32>
    %32 = arith.mulf %30, %31 : vector<8x256xf32>
    %33 = arith.addf %27, %32 : vector<8x256xf32>
    %c15_i32 = arith.constant 15 : i32
    %34 = tpu.dynamic_rotate %1 by %c15_i32 dim 1 : vector<8x256xf32>, i32 -> vector<8x256xf32>
    %35 = vector.broadcast %15 : vector<1x256xf32> to vector<8x256xf32>
    %36 = arith.mulf %34, %35 : vector<8x256xf32>
    %37 = vector.broadcast %5 : vector<8x1xf32> to vector<8x256xf32>
    %38 = arith.mulf %36, %37 : vector<8x256xf32>
    %39 = arith.addf %33, %38 : vector<8x256xf32>
    %c1_i32 = arith.constant 1 : i32
    %40 = tpu.dynamic_rotate %1 by %c1_i32 dim 1 : vector<8x256xf32>, i32 -> vector<8x256xf32>
    %41 = vector.broadcast %16 : vector<1x256xf32> to vector<8x256xf32>
    %42 = arith.mulf %40, %41 : vector<8x256xf32>
    %43 = vector.broadcast %6 : vector<8x1xf32> to vector<8x256xf32>
    %44 = arith.mulf %42, %43 : vector<8x256xf32>
    %45 = arith.addf %39, %44 : vector<8x256xf32>
    %46 = vector.broadcast %7 : vector<8x1xf32> to vector<8x256xf32>
    %47 = arith.mulf %1, %46 : vector<8x256xf32>
    %48 = arith.addf %45, %47 : vector<8x256xf32>
    %c255_i32 = arith.constant 255 : i32
    %49 = tpu.dynamic_rotate %1 by %c255_i32 dim 1 : vector<8x256xf32>, i32 -> vector<8x256xf32>
    %50 = vector.broadcast %17 : vector<1x256xf32> to vector<8x256xf32>
    %51 = arith.mulf %49, %50 : vector<8x256xf32>
    %52 = vector.broadcast %8 : vector<8x1xf32> to vector<8x256xf32>
    %53 = arith.mulf %51, %52 : vector<8x256xf32>
    %54 = arith.addf %48, %53 : vector<8x256xf32>
    %c241_i32 = arith.constant 241 : i32
    %55 = tpu.dynamic_rotate %1 by %c241_i32 dim 1 : vector<8x256xf32>, i32 -> vector<8x256xf32>
    %56 = vector.broadcast %18 : vector<1x256xf32> to vector<8x256xf32>
    %57 = arith.mulf %55, %56 : vector<8x256xf32>
    %58 = vector.broadcast %9 : vector<8x1xf32> to vector<8x256xf32>
    %59 = arith.mulf %57, %58 : vector<8x256xf32>
    %60 = arith.addf %54, %59 : vector<8x256xf32>
    %c240_i32 = arith.constant 240 : i32
    %61 = tpu.dynamic_rotate %1 by %c240_i32 dim 1 : vector<8x256xf32>, i32 -> vector<8x256xf32>
    %62 = vector.broadcast %19 : vector<1x256xf32> to vector<8x256xf32>
    %63 = arith.mulf %61, %62 : vector<8x256xf32>
    %64 = vector.broadcast %10 : vector<8x1xf32> to vector<8x256xf32>
    %65 = arith.mulf %63, %64 : vector<8x256xf32>
    %66 = arith.addf %60, %65 : vector<8x256xf32>
    %c239_i32 = arith.constant 239 : i32
    %67 = tpu.dynamic_rotate %1 by %c239_i32 dim 1 : vector<8x256xf32>, i32 -> vector<8x256xf32>
    %68 = vector.broadcast %20 : vector<1x256xf32> to vector<8x256xf32>
    %69 = arith.mulf %67, %68 : vector<8x256xf32>
    %70 = vector.broadcast %11 : vector<8x1xf32> to vector<8x256xf32>
    %71 = arith.mulf %69, %70 : vector<8x256xf32>
    %72 = arith.addf %66, %71 : vector<8x256xf32>
    %c0_6 = arith.constant 0 : index
    %c0_7 = arith.constant 0 : index
    %73 = vector.load %arg3[%c0_6, %c0_7] : memref<8x4xf32, #tpu.memory_space<vmem>>, vector<8x4xf32>
    %c0_8 = arith.constant 0 : index
    %c0_9 = arith.constant 0 : index
    %74 = vector.load %arg4[%c0_8, %c0_9] : memref<8x1xf32, #tpu.memory_space<vmem>>, vector<8x1xf32>
    %75 = vector.extract_strided_slice %72 {offsets = [0, 0], sizes = [4, 256], strides = [1, 1]} : vector<8x256xf32> to vector<4x256xf32>
    %cst_10 = arith.constant 0.000000e+00 : f32
    %76 = vector.broadcast %cst_10 : f32 to vector<8x256xf32>
    %77 = vector.extract_strided_slice %75 {offsets = [0, 0], sizes = [1, 256], strides = [1, 1]} : vector<4x256xf32> to vector<1x256xf32>
    %78 = vector.extract_strided_slice %73 {offsets = [0, 0], sizes = [8, 1], strides = [1, 1]} : vector<8x4xf32> to vector<8x1xf32>
    %79 = vector.broadcast %77 : vector<1x256xf32> to vector<8x256xf32>
    %80 = vector.broadcast %78 : vector<8x1xf32> to vector<8x256xf32>
    %81 = arith.mulf %79, %80 : vector<8x256xf32>
    %82 = arith.addf %76, %81 : vector<8x256xf32>
    %83 = vector.extract_strided_slice %75 {offsets = [1, 0], sizes = [1, 256], strides = [1, 1]} : vector<4x256xf32> to vector<1x256xf32>
    %84 = vector.extract_strided_slice %73 {offsets = [0, 1], sizes = [8, 1], strides = [1, 1]} : vector<8x4xf32> to vector<8x1xf32>
    %85 = vector.broadcast %83 : vector<1x256xf32> to vector<8x256xf32>
    %86 = vector.broadcast %84 : vector<8x1xf32> to vector<8x256xf32>
    %87 = arith.mulf %85, %86 : vector<8x256xf32>
    %88 = arith.addf %82, %87 : vector<8x256xf32>
    %89 = vector.extract_strided_slice %75 {offsets = [2, 0], sizes = [1, 256], strides = [1, 1]} : vector<4x256xf32> to vector<1x256xf32>
    %90 = vector.extract_strided_slice %73 {offsets = [0, 2], sizes = [8, 1], strides = [1, 1]} : vector<8x4xf32> to vector<8x1xf32>
    %91 = vector.broadcast %89 : vector<1x256xf32> to vector<8x256xf32>
    %92 = vector.broadcast %90 : vector<8x1xf32> to vector<8x256xf32>
    %93 = arith.mulf %91, %92 : vector<8x256xf32>
    %94 = arith.addf %88, %93 : vector<8x256xf32>
    %95 = vector.extract_strided_slice %75 {offsets = [3, 0], sizes = [1, 256], strides = [1, 1]} : vector<4x256xf32> to vector<1x256xf32>
    %96 = vector.extract_strided_slice %73 {offsets = [0, 3], sizes = [8, 1], strides = [1, 1]} : vector<8x4xf32> to vector<8x1xf32>
    %97 = vector.broadcast %95 : vector<1x256xf32> to vector<8x256xf32>
    %98 = vector.broadcast %96 : vector<8x1xf32> to vector<8x256xf32>
    %99 = arith.mulf %97, %98 : vector<8x256xf32>
    %100 = arith.addf %94, %99 : vector<8x256xf32>
    %101 = vector.broadcast %74 : vector<8x1xf32> to vector<8x256xf32>
    %102 = arith.addf %100, %101 : vector<8x256xf32>
    %103 = vector.extract_strided_slice %72 {offsets = [4, 0], sizes = [4, 256], strides = [1, 1]} : vector<8x256xf32> to vector<4x256xf32>
    %cst_11 = arith.constant 0.000000e+00 : f32
    %104 = vector.broadcast %cst_11 : f32 to vector<8x256xf32>
    %105 = vector.extract_strided_slice %103 {offsets = [0, 0], sizes = [1, 256], strides = [1, 1]} : vector<4x256xf32> to vector<1x256xf32>
    %106 = vector.extract_strided_slice %73 {offsets = [0, 0], sizes = [8, 1], strides = [1, 1]} : vector<8x4xf32> to vector<8x1xf32>
    %107 = vector.broadcast %105 : vector<1x256xf32> to vector<8x256xf32>
    %108 = vector.broadcast %106 : vector<8x1xf32> to vector<8x256xf32>
    %109 = arith.mulf %107, %108 : vector<8x256xf32>
    %110 = arith.addf %104, %109 : vector<8x256xf32>
    %111 = vector.extract_strided_slice %103 {offsets = [1, 0], sizes = [1, 256], strides = [1, 1]} : vector<4x256xf32> to vector<1x256xf32>
    %112 = vector.extract_strided_slice %73 {offsets = [0, 1], sizes = [8, 1], strides = [1, 1]} : vector<8x4xf32> to vector<8x1xf32>
    %113 = vector.broadcast %111 : vector<1x256xf32> to vector<8x256xf32>
    %114 = vector.broadcast %112 : vector<8x1xf32> to vector<8x256xf32>
    %115 = arith.mulf %113, %114 : vector<8x256xf32>
    %116 = arith.addf %110, %115 : vector<8x256xf32>
    %117 = vector.extract_strided_slice %103 {offsets = [2, 0], sizes = [1, 256], strides = [1, 1]} : vector<4x256xf32> to vector<1x256xf32>
    %118 = vector.extract_strided_slice %73 {offsets = [0, 2], sizes = [8, 1], strides = [1, 1]} : vector<8x4xf32> to vector<8x1xf32>
    %119 = vector.broadcast %117 : vector<1x256xf32> to vector<8x256xf32>
    %120 = vector.broadcast %118 : vector<8x1xf32> to vector<8x256xf32>
    %121 = arith.mulf %119, %120 : vector<8x256xf32>
    %122 = arith.addf %116, %121 : vector<8x256xf32>
    %123 = vector.extract_strided_slice %103 {offsets = [3, 0], sizes = [1, 256], strides = [1, 1]} : vector<4x256xf32> to vector<1x256xf32>
    %124 = vector.extract_strided_slice %73 {offsets = [0, 3], sizes = [8, 1], strides = [1, 1]} : vector<8x4xf32> to vector<8x1xf32>
    %125 = vector.broadcast %123 : vector<1x256xf32> to vector<8x256xf32>
    %126 = vector.broadcast %124 : vector<8x1xf32> to vector<8x256xf32>
    %127 = arith.mulf %125, %126 : vector<8x256xf32>
    %128 = arith.addf %122, %127 : vector<8x256xf32>
    %129 = vector.broadcast %74 : vector<8x1xf32> to vector<8x256xf32>
    %130 = arith.addf %128, %129 : vector<8x256xf32>
    %131 = tpu.concatenate %102, %130 in 0 : vector<8x256xf32>, vector<8x256xf32> -> vector<16x256xf32>
    %c0_12 = arith.constant 0 : index
    %c0_13 = arith.constant 0 : index
    %c0_14 = arith.constant 0 : index
    %132 = vector.load %arg6[%c0_12, %c0_13, %c0_14] : memref<1x16x256xf32, #tpu.memory_space<vmem>>, vector<1x16x256xf32>
    %133 = vector.shape_cast %132 : vector<1x16x256xf32> to vector<16x256xf32>
    %134 = vector.shape_cast %131 : vector<16x256xf32> to vector<1x16x256xf32>
    tpu.vector_store %arg6[%c0_12, %c0_13, %c0_14], %134 {strides = array<i32>} : memref<1x16x256xf32, #tpu.memory_space<vmem>>, vector<1x16x256xf32>,
    return
  }
  func.func @transform_0(%arg0: i32) -> (i32, i32, i32) {
    %c0_i32 = arith.constant 0 : i32
    %c0_i32_0 = arith.constant 0 : i32
    %c0_i32_1 = arith.constant 0 : i32
    return %arg0, %c0_i32, %c0_i32_0 : i32, i32, i32
  }
  func.func @transform_1(%arg0: i32) -> (i32, i32) {
    %c0_i32 = arith.constant 0 : i32
    %c0_i32_0 = arith.constant 0 : i32
    %c0_i32_1 = arith.constant 0 : i32
    return %c0_i32, %c0_i32_0 : i32, i32
  }
  func.func @transform_2(%arg0: i32) -> (i32, i32) {
    %c0_i32 = arith.constant 0 : i32
    %c0_i32_0 = arith.constant 0 : i32
    %c0_i32_1 = arith.constant 0 : i32
    return %c0_i32, %c0_i32_0 : i32, i32
  }
  func.func @transform_3(%arg0: i32) -> (i32, i32) {
    %c0_i32 = arith.constant 0 : i32
    %c0_i32_0 = arith.constant 0 : i32
    %c0_i32_1 = arith.constant 0 : i32
    return %c0_i32, %c0_i32_0 : i32, i32
  }
  func.func @transform_4(%arg0: i32) -> (i32, i32) {
    %c0_i32 = arith.constant 0 : i32
    %c0_i32_0 = arith.constant 0 : i32
    %c0_i32_1 = arith.constant 0 : i32
    return %c0_i32, %c0_i32_0 : i32, i32
  }
  func.func @transform_5(%arg0: i32) -> (i32, i32, i32) {
    %c0_i32 = arith.constant 0 : i32
    %c0_i32_0 = arith.constant 0 : i32
    %c0_i32_1 = arith.constant 0 : i32
    return %arg0, %c0_i32, %c0_i32_0 : i32, i32, i32
  }
}

</mosaic_0001>

<bundles_post_ra>
// kernel: tpu_custom_call.1
= control target key start
LH: loop header
LB: loop body
LE: loop exit
PB: predicated region body
PF: predicated region fallthrough
CT: control target
= control target key end

     0   :  { %10 = vsyncpa [#allocation3], 0  ;;  %s753_s0 = inlined_call_operand.hbm [shape: f32[1,8,256], index: 0, kind: input, shape index: {}]   ;;  %s754_s1 = inlined_call_operand.hbm [shape: f32[8,9], index: 1, kind: input, shape index: {}]   ;;  %s755_s2 = inlined_call_operand.vmem [shape: f32[8,4], index: 2, kind: input, shape index: {}]   ;;  %s756_s3 = inlined_call_operand.vmem [shape: f32[8,1], index: 3, kind: input, shape index: {}]   ;;  %s757_s4 = inlined_call_operand.vmem [shape: f32[9,256], index: 4, kind: input, shape index: {}]   ;;  %s758_s5 = inlined_call_operand.hbm [shape: f32[1,16,256], index: 5, kind: output, shape index: {}]  }
   0x1   :  { %11 = vsyncpa [#allocation6], 0 }
   0x2   :  { %12 = vsyncpa [#allocation4], 0  ;;  %s519_s18 = smov [#allocation2]   ;;  %s520_s20 = smov [#allocation5]  }
   0x3   :  { %s19_s19 = sshll.u32 %s519_s18, 4  ;;  %s29_s21 = sshll.u32 %s520_s20, 4  ;;  %s20_s19 = int_to_ptr.vmem [resolvable:$true] %s19_s19  ;;  %s30_s21 = int_to_ptr.vmem [resolvable:$true] %s29_s21 }
   0x4   :  { %s447_s24 = scalar_lea.hbm %s753_s0, 256 }
   0x5   :  { %p448_p0 = scmp.ne.s32.totalorder %s753_s0, %s447_s24  ;;  %p451_p1 = scmp.lt.u32.totalorder %s447_s24, %s753_s0 }
   0x7   :  { %p453_p2 = pnand %p451_p1, %p448_p0 }
   0x9   :  { %456 = shalt.err (!%p453_p2)
}
   0xa   :  { %s457_s29 = scalar_lea.vmem %s20_s19, 256  ;;  %p462_p4 = scmp.lt.s32.totalorder %s20_s19, %s20_s19 }
   0xb   :  { %p458_p3 = scmp.ne.s32.totalorder %s20_s19, %s457_s29  ;;  %p463_p5 = scmp.lt.s32.totalorder %s457_s29, %s457_s29 }
   0xd   :  { %p464_p6 = por %p463_p5, %p462_p4 }
   0xf   :  { %p465_p7 = pnand %p464_p6, %p458_p3 }
  0x11   :  { %468 = shalt.err (!%p465_p7)
}
  0x12   :  { %22 = dma.hbm_to_vmem [thread:$0]  %s753_s0, 256, %s20_s19, [#allocation3]  }
  0x13   :  { %s469_s9 = scalar_lea.hbm %s754_s1, 128 }
  0x14   :  { %p470_p8 = scmp.ne.s32.totalorder %s754_s1, %s469_s9  ;;  %p473_p9 = scmp.lt.u32.totalorder %s469_s9, %s754_s1 }
  0x16   :  { %p475_p10 = pnand %p473_p9, %p470_p8 }
  0x18   :  { %478 = shalt.err (!%p475_p10)
}
  0x19   :  { %s479_s14 = scalar_lea.vmem %s30_s21, 128  ;;  %p484_p12 = scmp.lt.s32.totalorder %s30_s21, %s30_s21 }
  0x1a   :  { %p480_p11 = scmp.ne.s32.totalorder %s30_s21, %s479_s14  ;;  %p485_p13 = scmp.lt.s32.totalorder %s479_s14, %s479_s14 }
  0x1c   :  { %p486_p0 = por %p485_p13, %p484_p12 }
  0x1e   :  { %p487_p1 = pnand %p486_p0, %p480_p11 }
  0x20   :  { %490 = shalt.err (!%p487_p1)
}
  0x21   :  { %32 = dma.hbm_to_vmem [thread:$0]  %s754_s1, 128, %s30_s21, [#allocation6]  }
  0x22   :  { %513 = dma.done.wait [#allocation3], 256  }
  0x23   :  { %514 = vsyncadd [#allocation3], 4294967040 }
  0x24   :  { %515 = dma.done.wait [#allocation6], 128  }
  0x25   :  { %516 = vsyncadd [#allocation6], 4294967168  ;;  %v521_v0 = vmov 2   ;;  %v522_v1 = vmov 0   ;;  %v47_v2 = vld [vmem:[#allocation5] sm:$0xff]  ;;  %v594_v3 = vld [vmem:[#allocation2] sm:$0xff]  ;;  %v56_v23 = vlaneseq }
  0x26   :  { %434 = vset.pattern.permute.xlu1 %v521_v0  ;;  %432 = vset.pattern.permute.xlu0 %v522_v1  ;;  %s523_s16 = smov 17   ;;  %v524_v4 = vmov 1   ;;  %v597_v5 = vld [vmem:[#allocation2 + $0x8] sm:$0xff]  ;;  %v525_v6 = vmov 6   ;;  %s526_s1 = smov 16   ;;  %v527_v7 = vmov 3  }
  0x27   :  { %123 = vperm.xlu1 %434, %v47_v2   ;;  %73 = vperm.xlu0 %432, %v47_v2   ;;  %s528_s17 = smov 15   ;;  %v529_v8 = vmov 4   ;;  %v530_v9 = vmov 5   ;;  %s531_s18 = smov 1   ;;  %v533_v10 = vmov 8   ;;  %v535_v11 = vmov 7  }
  0x28   :  { %s532_s19 = smov 127   ;;  %s534_s20 = smov 113   ;;  %v263_v12 = vld [vmem:[%s755_s2] sm:$0xff]  ;;  %v624_v26 = vshrl.u32 %v56_v23, 7  ;;  %v626_v27 = vand.u32 127, %v56_v23  ;;  %v648_v34 = vld [vmem:[%s757_s4 + $0x8] sm:$0xff] }
  0x29   :  { %s536_s21 = smov 111   ;;  %s537_s24 = smov 112   ;;  %v264_v13 = vld [vmem:[%s756_s3] sm:$0xff] }
  0x2a   :  { %v629_v28 = vsub.s32 1, %v624_v26  ;;  %v634_v31 = vsub.s32 0, %v624_v26  ;;  %vm84_vm0 = vcmp.lt.s32.totalorder %v626_v27, 16  ;;  %v638_v32 = vsub.s32 2, %v624_v26  ;;  %v643_v33 = vld [vmem:[%s757_s4] sm:$0xff] }
  0x2b   :  { %52 = vrot.lane.b32.xlu1 %v594_v3, %s523_s16  ;;  %433 = vset.pattern.permute.xlu0 %v524_v4  ;;  %vm58_vm1 = vcmp.lt.s32.totalorder %v626_v27, 17  ;;  %vm109_vm2 = vcmp.lt.s32.totalorder %v626_v27, 15  ;;  %v659_v40 = vsub.s32 3, %v624_v26  ;;  %vm134_vm3 = vcmp.lt.s32.totalorder %v626_v27, 1 }
  0x2c   :  { %98 = vperm.xlu0 %433, %v47_v2   ;;  %438 = vset.pattern.permute.xlu1 %v525_v6  ;;  %v90_v35 = vrot.slane %v643_v33, %v629_v28  ;;  %v94_v36 = vrot.slane %v648_v34, %v629_v28  ;;  %v64_v41 = vrot.slane %v643_v33, %v634_v31  ;;  %v677_v61 = vsub.s32 5, %v624_v26 }
  0x2d   :  { %v68_v42 = vrot.slane %v648_v34, %v634_v31  ;;  %v115_v43 = vrot.slane %v643_v33, %v638_v32  ;;  %v119_v47 = vrot.slane %v648_v34, %v638_v32  ;;  %v140_v53 = vrot.slane %v643_v33, %v659_v40 }
  0x2e   :  { %v144_v54 = vrot.slane %v648_v34, %v659_v40  ;;  %vm167_vm4 = vcmp.lt.s32.totalorder %v626_v27, 127  ;;  %vm192_vm5 = vcmp.lt.s32.totalorder %v626_v27, 113  ;;  %v695_v23 = vsub.s32 7, %v624_v26 }
  0x2f   :  { %54 = vrot.lane.b32.xlu1 %v597_v5, %s523_s16  ;;  %vm217_vm6 = vcmp.lt.s32.totalorder %v626_v27, 112  ;;  %vm242_vm7 = vcmp.lt.s32.totalorder %v626_v27, 111 }
  0x30   :  { %80 = vrot.lane.b32.xlu0 %v594_v3, %s526_s1 }
  0x31   :  { %435 = vset.pattern.permute.xlu0 %v527_v7 }
  0x33   :  { %82 = vrot.lane.b32.xlu1 %v597_v5, %s526_s1 }
  0x34   :  { %148 = vperm.xlu0 %435, %v47_v2  }
  0x37   :  { %105 = vrot.lane.b32.xlu1 %v594_v3, %s528_s17 }
  0x38   :  { %436 = vset.pattern.permute.xlu0 %v529_v8  ;;  %v681_v8 = vsub.s32 6, %v624_v26 }
  0x39   :  { %156 = vperm.xlu0 %436, %v47_v2  }
  0x3b   :  { %107 = vrot.lane.b32.xlu1 %v597_v5, %s528_s17 }
  0x3d   :  { %437 = vset.pattern.permute.xlu0 %v530_v9 }
  0x3e   :  { %181 = vperm.xlu0 %437, %v47_v2  }
  0x3f   :  { %130 = vrot.lane.b32.xlu1 %v594_v3, %s531_s18 }
  0x42   :  { %165 = vrot.lane.b32.xlu0 %v597_v5, %s532_s19 }
  0x43   :  { %132 = vrot.lane.b32.xlu1 %v597_v5, %s531_s18  ;;  %440 = vset.pattern.permute.xlu0 %v533_v10 }
  0x46   :  { %188 = vrot.lane.b32.xlu0 %v594_v3, %s534_s20 }
  0x47   :  { %206 = vperm.xlu1 %438, %v47_v2  }
  0x4a   :  { %256 = vperm.xlu0 %440, %v47_v2  }
  0x4b   :  { %163 = vrot.lane.b32.xlu1 %v594_v3, %s532_s19 }
  0x4c   :  { %439 = vset.pattern.permute.xlu1 %v535_v11  ;;  %v173_v11 = vrot.slane %v643_v33, %v677_v61 }
  0x4e   :  { %238 = vrot.lane.b32.xlu0 %v594_v3, %s536_s21 }
  0x4f   :  { %231 = vperm.xlu1 %439, %v47_v2   ;;  %441 = vset.pattern.permute.xlu0 %v522_v1 }
  0x52   :  { %275 = vperm.xlu0 %441, %v263_v12  }
  0x53   :  { %190 = vrot.lane.b32.xlu1 %v597_v5, %s534_s20 }
  0x54   :  { %442 = vset.pattern.permute.xlu1 %v524_v4 }
  0x56   :  { %444 = vset.pattern.permute.xlu0 %v527_v7 }
  0x57   :  { %213 = vrot.lane.b32.xlu1 %v594_v3, %s537_s24  ;;  %323 = vperm.xlu0 %444, %v263_v12  }
  0x5b   :  { %215 = vrot.lane.b32.xlu1 %v597_v5, %s537_s24  ;;  %446 = vset.pattern.permute.xlu0 %v522_v1 }
  0x5f   :  { %240 = vrot.lane.b32.xlu1 %v597_v5, %s536_s21 }
  0x63   :  { %291 = vperm.xlu1 %442, %v263_v12  }
  0x67   :  { %443 = vset.pattern.permute.xlu1 %v521_v0 }
  0x68   :  { %307 = vperm.xlu1 %443, %v263_v12  }
  0x6c   :  { %445 = vset.pattern.permute.xlu1 %v522_v1 }
  0x6d   :  { %332 = vperm.xlu1 %445, %v264_v13  }
  0xa6   :  { %v622_v14 = vpop.permute.xlu1 %123  ;;  %v74_v16 = vpop.permute.xlu0 %73 }
  0xaa   :  { %v53_v15 = vpop.permute.xlu1 %52 }
  0xab   :  { %v99_v18 = vpop.permute.xlu0 %98 }
  0xae   :  { %v55_v17 = vpop.permute.xlu1 %54 }
  0xaf   :  { %v81_v21 = vpop.permute.xlu0 %80  ;;  %v59_v45 = vsel %vm58_vm1, %v53_v15, %v55_v17  ;;  %v60_v46 = vsel %vm58_vm1, %v55_v17, %v53_v15  ;;  %v177_v15 = vrot.slane %v648_v34, %v677_v61 }
  0xb0   :  { %v69_v55 = vmul.f32 %v64_v41, %v60_v46  ;;  %v70_v56 = vmul.f32 %v68_v42, %v59_v45 }
  0xb2   :  { %v83_v19 = vpop.permute.xlu1 %82  ;;  %v76_v6 = vmul.f32 %v74_v16, %v69_v55  ;;  %v77_v7 = vmul.f32 %v74_v16, %v70_v56 }
  0xb3   :  { %v149_v24 = vpop.permute.xlu0 %148  ;;  %v85_v38 = vsel %vm84_vm0, %v81_v21, %v83_v19  ;;  %v86_v39 = vsel %vm84_vm0, %v83_v19, %v81_v21 }
  0xb4   :  { %v95_v48 = vmul.f32 %v90_v35, %v86_v39  ;;  %v96_v49 = vmul.f32 %v94_v36, %v85_v38 }
  0xb6   :  { %v106_v20 = vpop.permute.xlu1 %105  ;;  %v101_v62 = vmul.f32 %v99_v18, %v95_v48  ;;  %v102_v63 = vmul.f32 %v99_v18, %v96_v49  ;;  %v223_v49 = vrot.slane %v643_v33, %v695_v23 }
  0xb8   :  { %v631_v29 = vpop.permute.xlu0 %156  ;;  %v103_v12 = vadd.f32 %v101_v62, %v76_v6  ;;  %v104_v13 = vadd.f32 %v102_v63, %v77_v7 }
  0xb9   :  { %v160_v42 = vmul.f32 %v631_v29, %v597_v5 }
  0xba   :  { %v108_v22 = vpop.permute.xlu1 %107 }
  0xbb   :  { %v110_v50 = vsel %vm109_vm2, %v106_v20, %v108_v22  ;;  %v111_v51 = vsel %vm109_vm2, %v108_v22, %v106_v20  ;;  %v198_v22 = vrot.slane %v643_v33, %v681_v8 }
  0xbc   :  { %v120_v59 = vmul.f32 %v115_v43, %v111_v51  ;;  %v121_v60 = vmul.f32 %v119_v47, %v110_v50  ;;  %v227_v50 = vrot.slane %v648_v34, %v695_v23 }
  0xbd   :  { %v667_v44 = vpop.permute.xlu0 %181 }
  0xbe   :  { %v131_v25 = vpop.permute.xlu1 %130  ;;  %v126_v9 = vmul.f32 %v622_v14, %v120_v59  ;;  %v127_v10 = vmul.f32 %v622_v14, %v121_v60  ;;  %v202_v14 = vrot.slane %v648_v34, %v681_v8 }
  0xc1   :  { %v166_v0 = vpop.permute.xlu0 %165 }
  0xc2   :  { %v133_v30 = vpop.permute.xlu1 %132 }
  0xc3   :  { %v135_v57 = vsel %vm134_vm3, %v131_v25, %v133_v30  ;;  %v136_v58 = vsel %vm134_vm3, %v133_v30, %v131_v25  ;;  %v128_v25 = vadd.f32 %v126_v9, %v103_v12  ;;  %v129_v30 = vadd.f32 %v127_v10, %v104_v13 }
  0xc4   :  { %v145_v2 = vmul.f32 %v140_v53, %v136_v58  ;;  %v146_v4 = vmul.f32 %v144_v54, %v135_v57  ;;  %v410_v57 = vld [vmem:[%s757_s4 + $0x18] ss:$0 sm:$0xff]  ;;  %v339_v10 = vsub.s32 4, %v624_v26 }
  0xc5   :  { %v189_v21 = vpop.permute.xlu0 %188 }
  0xc6   :  { %v655_v37 = vpop.permute.xlu1 %206  ;;  %v151_v17 = vmul.f32 %v149_v24, %v145_v2  ;;  %v152_v18 = vmul.f32 %v149_v24, %v146_v4  ;;  %v159_v24 = vmul.f32 %v631_v29, %v594_v3 }
  0xc8   :  { %v153_v43 = vadd.f32 %v151_v17, %v128_v25  ;;  %v154_v45 = vadd.f32 %v152_v18, %v129_v30 }
  0xc9   :  { %v257_v46 = vpop.permute.xlu0 %256 }
  0xca   :  { %v164_v52 = vpop.permute.xlu1 %163  ;;  %v161_v3 = vadd.f32 %v159_v24, %v153_v43  ;;  %v162_v5 = vadd.f32 %v160_v42, %v154_v45 }
  0xcb   :  { %v168_v19 = vsel %vm167_vm4, %v164_v52, %v166_v0  ;;  %v169_v20 = vsel %vm167_vm4, %v166_v0, %v164_v52 }
  0xcc   :  { %v178_v38 = vmul.f32 %v173_v11, %v168_v19  ;;  %v179_v39 = vmul.f32 %v177_v15, %v169_v20 }
  0xcd   :  { %v239_v60 = vpop.permute.xlu0 %238 }
  0xce   :  { %v232_v1 = vpop.permute.xlu1 %231  ;;  %v184_v51 = vmul.f32 %v667_v44, %v178_v38  ;;  %v185_v52 = vmul.f32 %v667_v44, %v179_v39  ;;  %v409_v44 = vld [vmem:[%s757_s4 + $0x10] ss:$0 sm:$0xff]  ;;  %s538_s4 = smov [#allocation7]  }
  0xcf   :  { %s396_s8 = sshll.u32 %s538_s4, 4  ;;  %s397_s8 = int_to_ptr.vmem [resolvable:$true] %s396_s8 }
  0xd0   :  { %v186_v58 = vadd.f32 %v184_v51, %v161_v3  ;;  %v187_v59 = vadd.f32 %v185_v52, %v162_v5  ;;  %s491_s9 = scalar_lea.vmem %s397_s8, 512  ;;  %p496_p3 = scmp.lt.s32.totalorder %s397_s8, %s397_s8 }
  0xd1   :  { %p492_p2 = scmp.ne.s32.totalorder %s397_s8, %s491_s9  ;;  %p497_p4 = scmp.lt.s32.totalorder %s491_s9, %s491_s9 }
  0xd2   :  { %v191_v16 = vpop.permute.xlu1 %190 }
  0xd3   :  { %v193_v35 = vsel %vm192_vm5, %v189_v21, %v191_v16  ;;  %v194_v36 = vsel %vm192_vm5, %v191_v16, %v189_v21  ;;  %v276_v21 = vpop.permute.xlu0 %275  ;;  %p498_p5 = por %p497_p4, %p496_p3 }
  0xd4   :  { %v203_v47 = vmul.f32 %v198_v22, %v193_v35  ;;  %v204_v48 = vmul.f32 %v202_v14, %v194_v36 }
  0xd5   :  { %p499_p6 = pnand %p498_p5, %p492_p2 }
  0xd6   :  { %v214_v41 = vpop.permute.xlu1 %213  ;;  %v209_v33 = vmul.f32 %v655_v37, %v203_v47  ;;  %v210_v55 = vmul.f32 %v655_v37, %v204_v48 }
  0xd8   :  { %v211_v4 = vadd.f32 %v209_v33, %v186_v58  ;;  %v212_v6 = vadd.f32 %v210_v55, %v187_v59 }
  0xda   :  { %v216_v53 = vpop.permute.xlu1 %215 }
  0xdb   :  { %v218_v29 = vsel %vm217_vm6, %v214_v41, %v216_v53  ;;  %v219_v54 = vsel %vm217_vm6, %v216_v53, %v214_v41 }
  0xdc   :  { %v228_v34 = vmul.f32 %v223_v49, %v218_v29  ;;  %v229_v56 = vmul.f32 %v227_v50, %v219_v54  ;;  %v324_v50 = vpop.permute.xlu0 %323 }
  0xde   :  { %v234_v62 = vmul.f32 %v232_v1, %v228_v34  ;;  %v235_v63 = vmul.f32 %v232_v1, %v229_v56  ;;  %v241_v0 = vpop.permute.xlu1 %240 }
  0xdf   :  { %v243_v2 = vsel %vm242_vm7, %v239_v60, %v241_v0  ;;  %v244_v37 = vsel %vm242_vm7, %v241_v0, %v239_v60 }
  0xe0   :  { %v253_v7 = vmul.f32 %v409_v44, %v243_v2  ;;  %v254_v9 = vmul.f32 %v410_v57, %v244_v37  ;;  %v236_v11 = vadd.f32 %v234_v62, %v211_v4  ;;  %v237_v12 = vadd.f32 %v235_v63, %v212_v6 }
  0xe2   :  { %v259_v13 = vmul.f32 %v257_v46, %v253_v7  ;;  %v260_v15 = vmul.f32 %v257_v46, %v254_v9  ;;  %v292_v27 = vpop.permute.xlu1 %291 }
  0xe4   :  { %v261_v16 = vadd.f32 %v259_v13, %v236_v11  ;;  %v262_v17 = vadd.f32 %v260_v15, %v237_v12 }
  0xe6   :  { %v268_v1 = vrot.slane %v261_v16, %v634_v31  ;;  %v272_v18 = vrot.slane %v262_v17, %v634_v31  ;;  %v340_v19 = vrot.slane %v261_v16, %v339_v10  ;;  %v344_v20 = vrot.slane %v262_v17, %v339_v10 }
  0xe7   :  { %v285_v22 = vrot.slane %v261_v16, %v629_v28  ;;  %v289_v14 = vrot.slane %v262_v17, %v629_v28  ;;  %v352_v26 = vrot.slane %v261_v16, %v677_v61  ;;  %v356_v25 = vrot.slane %v262_v17, %v677_v61  ;;  %v308_v49 = vpop.permute.xlu1 %307 }
  0xe8   :  { %v278_v30 = vmul.f32 %v276_v21, %v268_v1  ;;  %v279_v35 = vmul.f32 %v276_v21, %v272_v18  ;;  %v345_v36 = vmul.f32 %v340_v19, %v276_v21  ;;  %v346_v38 = vmul.f32 %v344_v20, %v276_v21 }
  0xe9   :  { %v294_v39 = vmul.f32 %v292_v27, %v285_v22  ;;  %v295_v41 = vmul.f32 %v292_v27, %v289_v14  ;;  %v357_v24 = vmul.f32 %v352_v26, %v292_v27  ;;  %v358_v31 = vmul.f32 %v356_v25, %v292_v27 }
  0xea   :  { %v317_v42 = vrot.slane %v261_v16, %v659_v40  ;;  %v321_v43 = vrot.slane %v262_v17, %v659_v40  ;;  %v376_v45 = vrot.slane %v261_v16, %v695_v23  ;;  %v380_v28 = vrot.slane %v262_v17, %v695_v23 }
  0xeb   :  { %v296_v46 = vadd.f32 %v294_v39, %v278_v30  ;;  %v297_v47 = vadd.f32 %v295_v41, %v279_v35  ;;  %v359_v48 = vadd.f32 %v357_v24, %v345_v36  ;;  %v360_v61 = vadd.f32 %v358_v31, %v346_v38 }
  0xec   :  { %v301_v51 = vrot.slane %v261_v16, %v638_v32  ;;  %v305_v52 = vrot.slane %v262_v17, %v638_v32  ;;  %v364_v53 = vrot.slane %v261_v16, %v681_v8  ;;  %v368_v3 = vrot.slane %v262_v17, %v681_v8  ;;  %v333_v59 = vpop.permute.xlu1 %332 }
  0xed   :  { %v326_v33 = vmul.f32 %v324_v50, %v317_v42  ;;  %v327_v23 = vmul.f32 %v324_v50, %v321_v43  ;;  %v381_v55 = vmul.f32 %v376_v45, %v324_v50  ;;  %v382_v34 = vmul.f32 %v380_v28, %v324_v50 }
  0xee   :  { %v310_v5 = vmul.f32 %v308_v49, %v301_v51  ;;  %v311_v40 = vmul.f32 %v308_v49, %v305_v52  ;;  %v369_v29 = vmul.f32 %v364_v53, %v308_v49  ;;  %v370_v54 = vmul.f32 %v368_v3, %v308_v49 }
  0xf0   :  { %v312_v56 = vadd.f32 %v310_v5, %v296_v46  ;;  %v313_v44 = vadd.f32 %v311_v40, %v297_v47  ;;  %v371_v57 = vadd.f32 %v369_v29, %v359_v48  ;;  %v372_v58 = vadd.f32 %v370_v54, %v360_v61 }
  0xf2   :  { %v328_v32 = vadd.f32 %v326_v33, %v312_v56  ;;  %v329_v60 = vadd.f32 %v327_v23, %v313_v44  ;;  %v383_v62 = vadd.f32 %v381_v55, %v371_v57  ;;  %v384_v63 = vadd.f32 %v382_v34, %v372_v58 }
  0xf4   :  { %v335_v8 = vadd.f32 %v333_v59, %v328_v32  ;;  %v336_v0 = vadd.f32 %v333_v59, %v329_v60  ;;  %v385_v2 = vadd.f32 %v383_v62, %v333_v59  ;;  %v386_v37 = vadd.f32 %v384_v63, %v333_v59 }
  0xf6   :  { %387 = vst [vmem:[#allocation7] sm:$0xff] %v335_v8  ;;  %388 = vst [vmem:[#allocation7 + $0x8] sm:$0xff] %v336_v0 }
  0xf7   :  { %389 = vst [vmem:[#allocation7 + $0x10] sm:$0xff] %v385_v2  ;;  %390 = vst [vmem:[#allocation7 + $0x18] sm:$0xff] %v386_v37 }
  0xf8   :  { %502 = shalt.err (!%p499_p6)
}
  0xf9   :  { %s503_s12 = scalar_lea.hbm %s758_s5, 512 }
  0xfa   :  { %p504_p7 = scmp.ne.s32.totalorder %s758_s5, %s503_s12  ;;  %p507_p8 = scmp.lt.u32.totalorder %s503_s12, %s758_s5 }
  0xfc   :  { %p509_p9 = pnand %p507_p8, %p504_p7 }
  0xfe   :  { %512 = shalt.err (!%p509_p9)
}
  0xff   :  { %s539_s16 = smov 256  }
 0x100   :  { %402 = dma.vmem_to_hbm [thread:$0]  %s397_s8, 512, %s758_s5, [#allocation4], %s539_s16, %s539_s16, %s526_s1  }
 0x101   :  { %517 = dma.done.wait [#allocation4], 512  }
 0x102   :  { %518 = vsyncadd [#allocation4], 4294966784 }
 0x103   :  { %406 = vsyncpa [#allocation3], 1 }
 0x104   :  { %407 = vsyncpa [#allocation6], 1 }
 0x105   :  { %408 = vsyncpa [#allocation4], 1 }

</bundles_post_ra>
